<compile_context>
chip_gen: v7x
topology: tpu7x:2x2x1
jax: 0.10.0
libtpu: 0.0.40
codegen_flags: <defaults>
</compile_context>

<pallas_src>
import functools

import jax
import jax.numpy as jnp
from jax.experimental import pallas as pl
from jax.experimental.pallas import tpu as pltpu


def _round_up(x, m):
    return ((x + m - 1) // m) * m


# --------------------------------------------------------------------------
# Single fused-MLP Pallas kernel: h = x; for each layer: h = act(h @ W + b)
# activations is a static tuple like ("relu", "relu", "tanh").
# --------------------------------------------------------------------------
def _fused_mlp_kernel(x_ref, *refs, activations):
    n_layers = len(activations)
    out_ref = refs[2 * n_layers]
    h = x_ref[...]
    for i in range(n_layers):
        w_ref = refs[2 * i]
        b_ref = refs[2 * i + 1]
        acc = jnp.dot(h, w_ref[...], preferred_element_type=jnp.float32)
        acc = acc + b_ref[...]                    # (1, N_pad) broadcasts
        act = activations[i]
        if act == "relu":
            acc = jnp.maximum(acc, 0.0)
        elif act == "tanh":
            acc = jnp.tanh(acc)                   # EUP path
        h = acc
    out_ref[...] = h.astype(out_ref.dtype)


def controller_forward(params, x, *, tile_m=256):
    """Controller forward: relu on all but last Linear, tanh on the last.

    params["weights"][i] is PyTorch-layout (out_features, in_features);
    params["biases"][i] is (out_features,). x is (B, input_dim).
    One pallas_call for the whole MLP.
    """
    weights = params["weights"]
    biases = params["biases"]
    n_layers = len(weights)
    B, in_dim = x.shape
    assert weights[0].shape[1] == in_dim

    LANE = 128
    in_pad = _round_up(in_dim, LANE)
    out_dims = [int(w.shape[0]) for w in weights]
    out_pads = [_round_up(n, LANE) for n in out_dims]

    # M (batch) tiling: multiple of 8 sublanes, capped at tile_m.
    TM = min(_round_up(B, 8), _round_up(tile_m, 8))
    M_pad = _round_up(B, TM)
    grid = (pl.cdiv(M_pad, TM),)

    x_p = jnp.zeros((M_pad, in_pad), jnp.float32)
    x_p = x_p.at[:B, :in_dim].set(x.astype(jnp.float32))

    # Zero-pad weights (transposed to (K, N)) and biases to lane multiples.
    w_inputs = []
    in_specs = [pl.BlockSpec((TM, in_pad), lambda i: (i, 0))]
    k_pad, k_dim = in_pad, in_dim
    for li in range(n_layers):
        n_dim, n_pad = out_dims[li], out_pads[li]
        w = weights[li].astype(jnp.float32).T            # (K, N)
        w_p = jnp.zeros((k_pad, n_pad), jnp.float32).at[:k_dim, :n_dim].set(w)
        b_p = jnp.zeros((1, n_pad), jnp.float32).at[0, :n_dim].set(
            biases[li].astype(jnp.float32))
        w_inputs += [w_p, b_p]
        in_specs += [
            pl.BlockSpec((k_pad, n_pad), lambda i: (0, 0)),
            pl.BlockSpec((1, n_pad), lambda i: (0, 0)),
        ]
        k_pad, k_dim = n_pad, n_dim

    activations = tuple(["relu"] * (n_layers - 1) + ["tanh"])
    kernel = functools.partial(_fused_mlp_kernel, activations=activations)

    out_pad = pl.pallas_call(
        kernel,
        out_shape=jax.ShapeDtypeStruct((M_pad, out_pads[-1]), jnp.float32),
        grid=grid,
        in_specs=in_specs,
        out_specs=pl.BlockSpec((TM, out_pads[-1]), lambda i: (i, 0)),
        compiler_params=pltpu.CompilerParams(
            dimension_semantics=("parallel",)),
    )(x_p, *w_inputs)

    return out_pad[:B, :out_dims[-1]]


# --------------------------------------------------------------------------
# Parameter init matching the PyTorch module: xavier_uniform_ weights,
# default nn.Linear bias init uniform(-1/sqrt(fan_in), 1/sqrt(fan_in)).
# Note: the original PyTorch `else` branch has a typo
# (`self.layers.append(prev_layer, ac_dim)`); we implement the obvious intent
# (final nn.Linear(prev_layer, ac_dim)).
# --------------------------------------------------------------------------
def init_controller_params(key, input_dim=256 + 32, layers=(), ac_dim=3):
    dims = [input_dim] + list(layers) + [ac_dim]
    weights, biases = [], []
    for i in range(len(dims) - 1):
        fan_in, fan_out = dims[i], dims[i + 1]
        key, kw_, kb_ = jax.random.split(key, 3)
        bound = (6.0 / (fan_in + fan_out)) ** 0.5       # xavier_uniform_
        w = jax.random.uniform(kw_, (fan_out, fan_in), jnp.float32,
                               -bound, bound)
        bb = 1.0 / (fan_in ** 0.5)
        b = jax.random.uniform(kb_, (fan_out,), jnp.float32, -bb, bb)
        weights.append(w)
        biases.append(b)
    return {"weights": weights, "biases": biases}


# --------------------------------------------------------------------------
# Pure-JAX reference (no Pallas) for the correctness check.
# --------------------------------------------------------------------------
def controller_reference(params, x):
    h = x
    n = len(params["weights"])
    for i in range(n - 1):
        h = jax.nn.relu(h @ params["weights"][i].T + params["biases"][i])
    return jnp.tanh(h @ params["weights"][-1].T + params["biases"][-1])


if __name__ == "__main__":
    batch = 2
    input_dim = 256 + 32            # Controller default
    ac_dim = 3

    key = jax.random.PRNGKey(0)
    key, kx = jax.random.split(key)
    x = jax.random.normal(kx, (batch, input_dim), dtype=jnp.float32)

    # Case 1: default config, layers=[] -> single Linear + tanh.
    key, kp = jax.random.split(key)
    params0 = init_controller_params(kp, input_dim, layers=(), ac_dim=ac_dim)
    out0 = controller_forward(params0, x)
    jax.block_until_ready(out0)
    ref0 = controller_reference(params0, x)
    assert out0.shape == (batch, ac_dim)
    assert jnp.allclose(out0, ref0, atol=1e-5, rtol=1e-5)

    # Case 2: hidden layers -> relu, relu, tanh, all fused in one pallas_call.
    key, kp = jax.random.split(key)
    params1 = init_controller_params(kp, input_dim, layers=(64, 32),
                                     ac_dim=ac_dim)
    out1 = controller_forward(params1, x)
    jax.block_until_ready(out1)
    ref1 = controller_reference(params1, x)
    assert out1.shape == (batch, ac_dim)
    assert jnp.allclose(out1, ref1, atol=1e-5, rtol=1e-5)

    print("KERNEL_OK")
</pallas_src>

<mosaic_0001>
module attributes {stable_mosaic.version = 11 : i64} {
  func.func @_fused_mlp_kernel(%arg0: i32, %arg1: memref<8x384xf32, #tpu.memory_space<vmem>>, %arg2: memref<384x128xf32, #tpu.memory_space<vmem>>, %arg3: memref<1x128xf32, #tpu.memory_space<vmem>>, %arg4: memref<8x128xf32, #tpu.memory_space<vmem>>) attributes {dimension_semantics = [#tpu.dimension_semantics<parallel>], iteration_bounds = array<i64: 1>, scalar_prefetch = 0 : i64, scratch_operands = 0 : i64, tpu.core_type = #tpu.core_type<tc>, window_params = [{transform_indices = @transform_0, window_bounds = array<i64: 8, 384>}, {pipeline_mode = #tpu.pipeline_mode<synchronous>, transform_indices = @transform_1, window_bounds = array<i64: 384, 128>}, {pipeline_mode = #tpu.pipeline_mode<synchronous>, transform_indices = @transform_2, window_bounds = array<i64: 1, 128>}, {transform_indices = @transform_3, window_bounds = array<i64: 8, 128>}]} {
    %c0 = arith.constant 0 : index
    %c0_0 = arith.constant 0 : index
    %0 = vector.load %arg1[%c0, %c0_0] : memref<8x384xf32, #tpu.memory_space<vmem>>, vector<8x384xf32>
    %c0_1 = arith.constant 0 : index
    %c0_2 = arith.constant 0 : index
    %1 = vector.load %arg2[%c0_1, %c0_2] : memref<384x128xf32, #tpu.memory_space<vmem>>, vector<384x128xf32>
    %cst = arith.constant dense<0.000000e+00> : vector<8x128xf32>
    %2 = tpu.matmul %0, %1, %cst {dimension_numbers = #tpu.dot_dimension_numbers<[1], [0], [0], [1], [0, 0, 1, 1], [], []>} : vector<8x384xf32>, vector<384x128xf32>, vector<8x128xf32> -> vector<8x128xf32>
    %c0_3 = arith.constant 0 : index
    %c0_4 = arith.constant 0 : index
    %3 = vector.load %arg3[%c0_3, %c0_4] : memref<1x128xf32, #tpu.memory_space<vmem>>, vector<1x128xf32>
    %4 = vector.broadcast %3 : vector<1x128xf32> to vector<8x128xf32>
    %5 = arith.addf %2, %4 : vector<8x128xf32>
    %6 = math.tanh %5 : vector<8x128xf32>
    %c0_5 = arith.constant 0 : index
    %c0_6 = arith.constant 0 : index
    %7 = vector.load %arg4[%c0_5, %c0_6] : memref<8x128xf32, #tpu.memory_space<vmem>>, vector<8x128xf32>
    tpu.vector_store %arg4[%c0_5, %c0_6], %6 {strides = array<i32>} : memref<8x128xf32, #tpu.memory_space<vmem>>, vector<8x128xf32>,
    return
  }
  func.func @transform_0(%arg0: i32) -> (i32, i32) {
    %c0_i32 = arith.constant 0 : i32
    %c0_i32_0 = arith.constant 0 : i32
    return %arg0, %c0_i32 : i32, i32
  }
  func.func @transform_1(%arg0: i32) -> (i32, i32) {
    %c0_i32 = arith.constant 0 : i32
    %c0_i32_0 = arith.constant 0 : i32
    %c0_i32_1 = arith.constant 0 : i32
    return %c0_i32, %c0_i32_0 : i32, i32
  }
  func.func @transform_2(%arg0: i32) -> (i32, i32) {
    %c0_i32 = arith.constant 0 : i32
    %c0_i32_0 = arith.constant 0 : i32
    %c0_i32_1 = arith.constant 0 : i32
    return %c0_i32, %c0_i32_0 : i32, i32
  }
  func.func @transform_3(%arg0: i32) -> (i32, i32) {
    %c0_i32 = arith.constant 0 : i32
    %c0_i32_0 = arith.constant 0 : i32
    return %arg0, %c0_i32 : i32, i32
  }
}

</mosaic_0001>

<bundles_post_ra>
// kernel: tpu_custom_call.1
= control target key start
LH: loop header
LB: loop body
LE: loop exit
PB: predicated region body
PF: predicated region fallthrough
CT: control target
= control target key end

     0   :  { %8 = vsyncpa [#allocation3], 0  ;;  %s565_s0 = inlined_call_operand.hbm [shape: f32[8,384], index: 0, kind: input, shape index: {}]   ;;  %s566_s1 = inlined_call_operand.hbm [shape: f32[384,128], index: 1, kind: input, shape index: {}]   ;;  %s567_s2 = inlined_call_operand.vmem [shape: f32[1,128], index: 2, kind: input, shape index: {}]   ;;  %s568_s3 = inlined_call_operand.hbm [shape: f32[8,128], index: 3, kind: output, shape index: {}]  }
   0x1   :  { %9 = vsyncpa [#allocation6], 0 }
   0x2   :  { %10 = vsyncpa [#allocation4], 0  ;;  %s483_s12 = smov [#allocation2]   ;;  %s484_s14 = smov [#allocation5]  }
   0x3   :  { %s17_s13 = sshll.u32 %s483_s12, 4  ;;  %s26_s15 = sshll.u32 %s484_s14, 4  ;;  %s18_s13 = int_to_ptr.vmem [resolvable:$true] %s17_s13  ;;  %s511_s15 = int_to_ptr.vmem [resolvable:$true] %s26_s15 }
   0x4   :  { %s411_s18 = scalar_lea.hbm %s565_s0, 384 }
   0x5   :  { %p412_p0 = scmp.ne.s32.totalorder %s565_s0, %s411_s18  ;;  %p415_p1 = scmp.lt.u32.totalorder %s411_s18, %s565_s0 }
   0x7   :  { %p417_p2 = pnand %p415_p1, %p412_p0 }
   0x9   :  { %420 = shalt.err (!%p417_p2)
}
   0xa   :  { %s421_s23 = scalar_lea.vmem %s18_s13, 384  ;;  %p426_p4 = scmp.lt.s32.totalorder %s18_s13, %s18_s13 }
   0xb   :  { %p422_p3 = scmp.ne.s32.totalorder %s18_s13, %s421_s23  ;;  %p427_p5 = scmp.lt.s32.totalorder %s421_s23, %s421_s23 }
   0xd   :  { %p428_p6 = por %p427_p5, %p426_p4 }
   0xf   :  { %p429_p7 = pnand %p428_p6, %p422_p3 }
  0x11   :  { %432 = shalt.err (!%p429_p7)
}
  0x12   :  { %20 = dma.hbm_to_vmem [thread:$0]  %s565_s0, 384, %s18_s13, [#allocation3]  }
  0x13   :  { %s433_s28 = scalar_lea.hbm %s566_s1, 6144 }
  0x14   :  { %p434_p8 = scmp.ne.s32.totalorder %s566_s1, %s433_s28  ;;  %p437_p9 = scmp.lt.u32.totalorder %s433_s28, %s566_s1 }
  0x16   :  { %p439_p10 = pnand %p437_p9, %p434_p8 }
  0x18   :  { %442 = shalt.err (!%p439_p10)
}
  0x19   :  { %s443_s6 = scalar_lea.vmem %s511_s15, 6144  ;;  %p448_p12 = scmp.lt.s32.totalorder %s511_s15, %s511_s15 }
  0x1a   :  { %p444_p11 = scmp.ne.s32.totalorder %s511_s15, %s443_s6  ;;  %p449_p13 = scmp.lt.s32.totalorder %s443_s6, %s443_s6 }
  0x1c   :  { %p450_p0 = por %p449_p13, %p448_p12 }
  0x1e   :  { %p451_p1 = pnand %p450_p0, %p444_p11 }
  0x20   :  { %454 = shalt.err (!%p451_p1)
}
  0x21   :  { %s485_s0 = smov 128   ;;  %s486_s7 = smov 8  }
  0x22   :  { %32 = dma.hbm_to_vmem [thread:$0]  %s566_s1, 6144, %s511_s15, [#allocation6], %s485_s0, %s485_s0, %s486_s7  }
  0x23   :  { %477 = dma.done.wait [#allocation3], 384  }
  0x24   :  { %478 = vsyncadd [#allocation3], 4294966912 }
  0x25   :  { %479 = dma.done.wait [#allocation6], 6144  }
  0x26   :  { %480 = vsyncadd [#allocation6], 4294961152  ;;  %v487_v0 = vmov 0.0|0.0   ;;  %vm488_vm0 = vmmov 0   ;;  %v489_v1 = vmov 0.0   ;;  %v60_v2 = vld [vmem:[#allocation5 + $0x80] sm:$0xff] }
  0x27   :  { %377 = vmatprep.subr.bf16.mxu1 %v487_v0  ;;  %342 = vmatprep.mubr.msk.f32.mxu1 %vm488_vm0, %v489_v1  ;;  %v61_v3 = vld [vmem:[#allocation5 + $0x88] sm:$0xff]  ;;  %v44_v4 = vld [vmem:[#allocation5] sm:$0xff]  ;;  %v62_v7 = vld [vmem:[#allocation5 + $0x90] sm:$0xff]  ;;  %s490_s11 = smov [#allocation7]  }
  0x28   :  { %v345_v5 = vpack.c.bf16 %v61_v3, %v60_v2  ;;  %v45_v6 = vld [vmem:[#allocation5 + $0x8] sm:$0xff]  ;;  %v63_v8 = vld [vmem:[#allocation5 + $0x98] sm:$0xff]  ;;  %v46_v11 = vld [vmem:[#allocation5 + $0x10] sm:$0xff]  ;;  %s247_s12 = sshll.u32 %s490_s11, 4  ;;  %s248_s12 = int_to_ptr.vmem [resolvable:$true] %s247_s12 }
  0x29   :  { %v347_v9 = vpack.c.bf16 %v45_v6, %v44_v4  ;;  %v349_v10 = vpack.c.bf16 %v63_v8, %v62_v7  ;;  %v47_v12 = vld [vmem:[#allocation5 + $0x18] sm:$0xff]  ;;  %v76_v13 = vld [vmem:[#allocation5 + $0x100] sm:$0xff]  ;;  %v77_v14 = vld [vmem:[#allocation5 + $0x108] sm:$0xff]  ;;  %s455_s13 = scalar_lea.vmem %s248_s12, 128  ;;  %p460_p3 = scmp.lt.s32.totalorder %s248_s12, %s248_s12 }
  0x2a   :  { %346 = vmatprep.subr.bf16.mxu0 %v345_v5  ;;  %v64_v15 = vld [vmem:[#allocation5 + $0xa0] sm:$0xff]  ;;  %v65_v16 = vld [vmem:[#allocation5 + $0xa8] sm:$0xff]  ;;  %v351_v17 = vpack.c.bf16 %v47_v12, %v46_v11  ;;  %v378_v18 = vpack.c.bf16 %v77_v14, %v76_v13  ;;  %v78_v19 = vld [vmem:[#allocation5 + $0x110] sm:$0xff]  ;;  %p456_p2 = scmp.ne.s32.totalorder %s248_s12, %s455_s13  ;;  %p461_p4 = scmp.lt.s32.totalorder %s455_s13, %s455_s13 }
  0x2b   :  { %348 = vmatpush3.bf16.msra.mxu0 %v347_v9  ;;  %v353_v20 = vpack.c.bf16 %v65_v16, %v64_v15  ;;  %v48_v21 = vld [vmem:[#allocation5 + $0x20] sm:$0xff]  ;;  %v49_v22 = vld [vmem:[#allocation5 + $0x28] sm:$0xff]  ;;  %v79_v23 = vld [vmem:[#allocation5 + $0x118] sm:$0xff] }
  0x2c   :  { %350 = vmatprep.subr.bf16.mxu0 %v349_v10  ;;  %379 = vmatpush3.bf16.msra.mxu1 %v378_v18  ;;  %v381_v24 = vpack.c.bf16 %v79_v23, %v78_v19  ;;  %v66_v25 = vld [vmem:[#allocation5 + $0xb0] sm:$0xff]  ;;  %v67_v26 = vld [vmem:[#allocation5 + $0xb8] sm:$0xff]  ;;  %v80_v27 = vld [vmem:[#allocation5 + $0x120] sm:$0xff]  ;;  %v355_v29 = vpack.c.bf16 %v49_v22, %v48_v21  ;;  %p462_p5 = por %p461_p4, %p460_p3 }
  0x2d   :  { %380 = vmatprep.subr.bf16.mxu1 %v487_v0  ;;  %v81_v28 = vld [vmem:[#allocation5 + $0x128] sm:$0xff]  ;;  %v357_v30 = vpack.c.bf16 %v67_v26, %v66_v25  ;;  %v50_v31 = vld [vmem:[#allocation5 + $0x30] sm:$0xff]  ;;  %v51_v32 = vld [vmem:[#allocation5 + $0x38] sm:$0xff] }
  0x2e   :  { %v384_v33 = vpack.c.bf16 %v81_v28, %v80_v27  ;;  %v68_v34 = vld [vmem:[#allocation5 + $0xc0] sm:$0xff]  ;;  %v69_v35 = vld [vmem:[#allocation5 + $0xc8] sm:$0xff]  ;;  %v82_v36 = vld [vmem:[#allocation5 + $0x130] sm:$0xff]  ;;  %v359_v38 = vpack.c.bf16 %v51_v32, %v50_v31  ;;  %p463_p6 = pnand %p462_p5, %p456_p2 }
  0x2f   :  { %352 = vmatpush3.bf16.msra.mxu0 %v351_v17  ;;  %v83_v37 = vld [vmem:[#allocation5 + $0x138] sm:$0xff]  ;;  %v361_v39 = vpack.c.bf16 %v69_v35, %v68_v34  ;;  %v52_v40 = vld [vmem:[#allocation5 + $0x40] sm:$0xff]  ;;  %v53_v41 = vld [vmem:[#allocation5 + $0x48] sm:$0xff] }
  0x30   :  { %354 = vmatprep.subr.bf16.mxu0 %v353_v20  ;;  %382 = vmatpush3.bf16.msra.mxu1 %v381_v24  ;;  %v387_v42 = vpack.c.bf16 %v83_v37, %v82_v36  ;;  %v70_v43 = vld [vmem:[#allocation5 + $0xd0] sm:$0xff]  ;;  %v71_v44 = vld [vmem:[#allocation5 + $0xd8] sm:$0xff]  ;;  %v84_v45 = vld [vmem:[#allocation5 + $0x140] sm:$0xff]  ;;  %v363_v48 = vpack.c.bf16 %v53_v41, %v52_v40 }
  0x31   :  { %383 = vmatprep.subr.bf16.mxu1 %v487_v0  ;;  %v85_v46 = vld [vmem:[#allocation5 + $0x148] sm:$0xff]  ;;  %v42_v47 = vld [vmem:[#allocation2 + $0x8] sm:$0xff]  ;;  %v365_v49 = vpack.c.bf16 %v71_v44, %v70_v43  ;;  %v55_v51 = vld [vmem:[#allocation5 + $0x58] sm:$0xff] }
  0x32   :  { %163 = vmatprep.mubr.f32.mxu0 %v42_v47  ;;  %v54_v50 = vld [vmem:[#allocation5 + $0x50] sm:$0xff]  ;;  %v390_v52 = vpack.c.bf16 %v85_v46, %v84_v45  ;;  %v72_v53 = vld [vmem:[#allocation5 + $0xe0] sm:$0xff]  ;;  %v73_v54 = vld [vmem:[#allocation5 + $0xe8] sm:$0xff] }
  0x33   :  { %356 = vmatpush3.bf16.msra.mxu0 %v355_v29  ;;  %v86_v55 = vld [vmem:[#allocation5 + $0x150] sm:$0xff]  ;;  %v87_v56 = vld [vmem:[#allocation5 + $0x158] sm:$0xff]  ;;  %v367_v57 = vpack.c.bf16 %v55_v51, %v54_v50  ;;  %v369_v58 = vpack.c.bf16 %v73_v54, %v72_v53  ;;  %v56_v59 = vld [vmem:[#allocation5 + $0x60] sm:$0xff] }
  0x34   :  { %358 = vmatprep.subr.bf16.mxu0 %v357_v30  ;;  %385 = vmatpush3.bf16.msra.mxu1 %v384_v33  ;;  %v57_v60 = vld [vmem:[#allocation5 + $0x68] sm:$0xff]  ;;  %v393_v61 = vpack.c.bf16 %v87_v56, %v86_v55  ;;  %v74_v62 = vld [vmem:[#allocation5 + $0xf0] sm:$0xff]  ;;  %v75_v63 = vld [vmem:[#allocation5 + $0xf8] sm:$0xff] }
  0x35   :  { %386 = vmatprep.subr.bf16.mxu1 %v487_v0  ;;  %v88_v1 = vld [vmem:[#allocation5 + $0x160] sm:$0xff]  ;;  %v89_v2 = vld [vmem:[#allocation5 + $0x168] sm:$0xff]  ;;  %v371_v3 = vpack.c.bf16 %v57_v60, %v56_v59  ;;  %v373_v4 = vpack.c.bf16 %v75_v63, %v74_v62  ;;  %v58_v5 = vld [vmem:[#allocation5 + $0x70] sm:$0xff] }
  0x36   :  { %v59_v6 = vld [vmem:[#allocation5 + $0x78] sm:$0xff]  ;;  %v396_v7 = vpack.c.bf16 %v89_v2, %v88_v1  ;;  %v90_v8 = vld [vmem:[#allocation5 + $0x170] sm:$0xff]  ;;  %v41_v12 = vld [vmem:[#allocation2] sm:$0xff] }
  0x37   :  { %360 = vmatpush3.bf16.msra.mxu0 %v359_v38  ;;  %v91_v9 = vld [vmem:[#allocation5 + $0x178] sm:$0xff]  ;;  %v375_v10 = vpack.c.bf16 %v59_v6, %v58_v5  ;;  %v257_v16 = vld [vmem:[%s567_s2] ss:$0 sm:$0xff] }
  0x38   :  { %362 = vmatprep.subr.bf16.mxu0 %v361_v39  ;;  %388 = vmatpush3.bf16.msra.mxu1 %v387_v42  ;;  %v399_v11 = vpack.c.bf16 %v91_v9, %v90_v8  ;;  %v43_v13 = vld [vmem:[#allocation2 + $0x10] sm:$0xff] }
  0x39   :  { %389 = vmatprep.subr.bf16.mxu1 %v487_v0 }
  0x3b   :  { %364 = vmatpush3.bf16.msra.mxu0 %v363_v48 }
  0x3c   :  { %366 = vmatprep.subr.bf16.mxu0 %v365_v49  ;;  %391 = vmatpush3.bf16.msra.mxu1 %v390_v52 }
  0x3d   :  { %392 = vmatprep.subr.bf16.mxu1 %v487_v0 }
  0x3f   :  { %368 = vmatpush3.bf16.msra.mxu0 %v367_v57 }
  0x40   :  { %370 = vmatprep.subr.bf16.mxu0 %v369_v58  ;;  %394 = vmatpush3.bf16.msra.mxu1 %v393_v61 }
  0x41   :  { %395 = vmatprep.subr.bf16.mxu1 %v487_v0 }
  0x43   :  { %372 = vmatpush3.bf16.msra.mxu0 %v371_v3 }
  0x44   :  { %374 = vmatprep.subr.bf16.mxu0 %v373_v4  ;;  %397 = vmatpush3.bf16.msra.mxu1 %v396_v7 }
  0x45   :  { %398 = vmatprep.subr.bf16.mxu1 %v487_v0 }
  0x47   :  { %376 = vmatpush3.bf16.msra.mxu0 %v375_v10 }
  0x48   :  { %400 = vmatpush3.bf16.msra.mxu1 %v399_v11 }
  0x4a   :  { %164 = vmatmul.mubr.f32.vlgmr.msra.gmra.mrb[0].mxu0 %v41_v12 }
  0x4b   :  { %343 = vmatmul.mubr.f32.vlgmr.msra.gmra.mrb[0].mxu1 %v43_v13 }
 0x11d   :  { %v290_v14 = vpop.f32.mrb[0].mxu0 }
 0x11e   :  { %v291_v15 = vpop.f32.mrb[1].mxu0  ;;  %v235_v18 = vpop.f32.mrb[0].mxu1 }
 0x11f   :  { %v292_v17 = vadd.f32 %v291_v15, %v290_v14  ;;  %v344_v19 = vpop.f32.mrb[1].mxu1 }
 0x121   :  { %v166_v20 = vadd.f32 %v292_v17, %v257_v16 }
 0x123   :  { %v236_v21 = vadd.f32 %v235_v18, %v166_v20 }
 0x125   :  { %409 = vtanh.f32 %v236_v21 }
 0x12f   :  { %v410_v0 = vpop.eup %409 }
 0x130   :  { %240 = vst [vmem:[#allocation7] sm:$0xff] %v410_v0 }
 0x131   :  { %466 = shalt.err (!%p463_p6)
}
 0x132   :  { %s467_s15 = scalar_lea.hbm %s568_s3, 128 }
 0x133   :  { %p468_p7 = scmp.ne.s32.totalorder %s568_s3, %s467_s15  ;;  %p471_p8 = scmp.lt.u32.totalorder %s467_s15, %s568_s3 }
 0x135   :  { %p473_p9 = pnand %p471_p8, %p468_p7 }
 0x137   :  { %476 = shalt.err (!%p473_p9)
}
 0x138   :  { %250 = dma.vmem_to_hbm [thread:$0]  %s248_s12, 128, %s568_s3, [#allocation4]  }
 0x139   :  { %481 = dma.done.wait [#allocation4], 128  }
 0x13a   :  { %482 = vsyncadd [#allocation4], 4294967168 }
 0x13b   :  { %254 = vsyncpa [#allocation3], 1 }
 0x13c   :  { %255 = vsyncpa [#allocation6], 1 }
 0x13d   :  { %256 = vsyncpa [#allocation4], 1 }

</bundles_post_ra>
